<compile_context>
chip_gen: v6e
topology: v6e:2x2x1
jax: 0.10.0
libtpu: 0.0.40
codegen_flags: <defaults>
</compile_context>

<pallas_src>
import functools

import jax
import jax.numpy as jnp
from jax.experimental import pallas as pl
from jax.experimental.pallas import tpu as pltpu


def _round_up(x, m):
    return (x + m - 1) // m * m


def _vmem_budgets():
    """(activation budget, vmem_limit_bytes) scaled to this generation's VMEM."""
    cap = 64 * 1024 * 1024                          # conservative default (v7x-like)
    try:
        info = pltpu.get_tpu_info()
        cap = int(getattr(info, "vmem_capacity_bytes", cap)) or cap
    except Exception:
        pass
    if cap >= 100 * 1024 * 1024:                    # v5e / v6e: 128 MiB VMEM
        return 48 * 1024 * 1024, 100 * 1024 * 1024
    return 20 * 1024 * 1024, 48 * 1024 * 1024       # v7x: 64 MiB physical VMEM


def _pick_tile_n(N, L, Cp, act_budget, mxu_itemsize, resident_bytes):
    """Batch-tile size: as large as VMEM allows, but with a >=2-step parallel grid."""
    budget = max(act_budget - 2 * resident_bytes, L * Cp * 64)
    # live f32 tiles (x0/h, y) + pipelined in/out copies + bf16 taps (hb, x_prev, x_next)
    row_bytes = L * Cp * (3 * 4 + 3 * mxu_itemsize + 4 * 4)
    tn = max(1, budget // row_bytes)
    tn = min(tn, N)
    if N >= 2:
        tn = min(tn, (N + 1) // 2)                  # >= 2 grid steps for v7x megacore
    return int(tn)


def _conv_prelu(h, w0, w1, w2, b, alpha, m_prev, m_next, mxu_dtype):
    """3-tap conv (padding=1) + bias + PReLU on one (tn, L, Cp) tile.

    w0/w1/w2 are the (Cp, Cp) tap matrices for x[l-1], x[l], x[l+1] in MXU dtype;
    contraction accumulates in f32 on the MXU.
    """
    tn, L, Cp = h.shape
    hb = h.astype(mxu_dtype)                        # cast once; masks run on bf16
    zero = jnp.zeros((), mxu_dtype)
    x_prev = jnp.where(m_prev, pltpu.roll(hb, shift=1, axis=1), zero)       # h[l-1]
    x_next = jnp.where(m_next, pltpu.roll(hb, shift=L - 1, axis=1), zero)   # h[l+1]
    y = jnp.dot(x_prev.reshape(tn * L, Cp), w0, preferred_element_type=jnp.float32)
    y = y + jnp.dot(hb.reshape(tn * L, Cp), w1, preferred_element_type=jnp.float32)
    y = y + jnp.dot(x_next.reshape(tn * L, Cp), w2, preferred_element_type=jnp.float32)
    y = y.reshape(tn, L, Cp) + b
    return jnp.where(y > 0.0, y, alpha * y)


def _fused_resunet_kernel(x_ref, w_ref, b_ref, a_ref, o_ref, *, num_convs, mxu_dtype):
    """Whole conv stack + residual for one N tile (batch_norm=False path).

    x_ref: (tn, L, Cp) f32     w_ref: (num_convs, 3, Cp, Cp) mxu_dtype
    b_ref: (num_convs, 1, Cp)  a_ref: (num_convs, 1, Cp)     o_ref: (tn, L, Cp) f32
    """
    x0 = x_ref[...]
    L = x0.shape[1]
    pos = jax.lax.broadcasted_iota(jnp.int32, (1, L, 1), 1)
    m_prev = pos >= 1            # x[l-1] exists
    m_next = pos <= L - 2        # x[l+1] exists
    h = x0
    for i in range(num_convs):
        h = _conv_prelu(h, w_ref[i, 0], w_ref[i, 1], w_ref[i, 2],
                        b_ref[i][None], a_ref[i][None], m_prev, m_next, mxu_dtype)
    o_ref[...] = h + x0


def _bn_layer_kernel(h_ref, sc_ref, sh_ref, w_ref, b_ref, a_ref,
                     y_ref, sum_ref, sq_ref, *, tile_n, n_real, mxu_dtype):
    """One conv layer of the batch_norm=True path, for one N tile.

    Applies the previous layer's folded BN affine (identity for layer 0), then
    conv + bias + PReLU; stores the pre-BN output and per-tile per-channel
    sum / sum-of-squares (padded batch rows masked out of the statistics).
    """
    h = h_ref[...] * sc_ref[...][None] + sh_ref[...][None]
    tn, L, _ = h.shape
    pos = jax.lax.broadcasted_iota(jnp.int32, (1, L, 1), 1)
    m_prev = pos >= 1
    m_next = pos <= L - 2
    y = _conv_prelu(h, w_ref[0], w_ref[1], w_ref[2],
                    b_ref[...][None], a_ref[...][None], m_prev, m_next, mxu_dtype)
    y_ref[...] = y
    if n_real is not None:       # zero out padded batch rows in the statistics
        row = jax.lax.broadcasted_iota(jnp.int32, (tn, 1, 1), 0)
        y = jnp.where(row + pl.program_id(0) * tile_n < n_real, y, 0.0)
    sum_ref[...] = jnp.sum(y, axis=(0, 1), keepdims=True)
    sq_ref[...] = jnp.sum(y * y, axis=(0, 1), keepdims=True)


def _bn_finalize_kernel(y_ref, sc_ref, sh_ref, x_ref, o_ref):
    """Last layer's folded BN affine fused with the residual add, one N tile."""
    o_ref[...] = y_ref[...] * sc_ref[...][None] + sh_ref[...][None] + x_ref[...]


def resunet_conv(x_ncl, weights, biases, alphas, gammas, betas, *,
                 batch_norm, mxu_dtype=jnp.bfloat16):
    """ResUNetConv forward.  x_ncl: (N, C, L) f32, weights: (num_convs, C, C, 3).

    mxu_dtype=bf16 is the default MXU-input dtype (f32 accumulation); pass
    jnp.float32 for bit-closer (slower) matmuls.
    """
    num_convs, C = weights.shape[0], weights.shape[1]
    N, _, L = x_ncl.shape
    Cp = _round_up(max(C, 128), 128)      # lane-dense channel dim
    pc = Cp - C

    # TODO(synk): for C << 64 an L-on-lanes layout (conv taps as lane rolls) avoids
    #             the 128/C lane-padding waste in HBM traffic and MXU work.
    # TODO(synk): in a full model keep activations persistently in padded NLC so the
    #             NCL<->NLC transpose/pad pair below is not paid once per call.
    x_nlc = jnp.pad(jnp.transpose(x_ncl, (0, 2, 1)), ((0, 0), (0, 0), (0, pc)))

    # (nc, Cout, Cin, 3) -> (nc, 3, Cin_p, Cout_p): tap order [l-1, l, l+1], MXU dtype.
    wk = jnp.transpose(weights, (0, 3, 2, 1))
    wk = jnp.pad(wk, ((0, 0), (0, 0), (0, pc), (0, pc))).astype(mxu_dtype)
    b = jnp.pad(biases, ((0, 0), (0, pc)))[:, None, :].astype(jnp.float32)
    a = jnp.broadcast_to(alphas[:, None, None], (num_convs, 1, Cp)).astype(jnp.float32)
    g = jnp.pad(gammas, ((0, 0), (0, pc))).astype(jnp.float32)      # zeros in pad lanes
    bt = jnp.pad(betas, ((0, 0), (0, pc))).astype(jnp.float32)

    act_budget, vmem_limit = _vmem_budgets()
    mxu_itemsize = jnp.dtype(mxu_dtype).itemsize
    w_layer_bytes = 3 * Cp * Cp * mxu_itemsize
    resident = w_layer_bytes * (num_convs if not batch_norm else 1)
    tile_n = _pick_tile_n(N, L, Cp, act_budget, mxu_itemsize, resident)
    num_tiles = (N + tile_n - 1) // tile_n
    n_pad = num_tiles * tile_n
    if n_pad != N:
        x_nlc = jnp.pad(x_nlc, ((0, n_pad - N), (0, 0), (0, 0)))

    cparams = pltpu.CompilerParams(dimension_semantics=("parallel",),
                                   vmem_limit_bytes=vmem_limit)
    act_spec = pl.BlockSpec((tile_n, L, Cp), lambda i: (i, 0, 0))
    vec_spec = pl.BlockSpec((1, Cp), lambda i: (0, 0))

    if not batch_norm:
        cost = pl.CostEstimate(
            flops=2 * num_convs * n_pad * L * 3 * Cp * Cp,
            transcendentals=0,
            bytes_accessed=4 * 2 * n_pad * L * Cp + num_convs * (w_layer_bytes + 8 * Cp))
        out_nlc = pl.pallas_call(
            functools.partial(_fused_resunet_kernel, num_convs=num_convs,
                              mxu_dtype=mxu_dtype),
            out_shape=jax.ShapeDtypeStruct((n_pad, L, Cp), jnp.float32),
            grid=(num_tiles,),
            in_specs=[
                act_spec,
                # TODO(synk): single-buffer these constant-index parameter blocks
                #             (pipeline_mode=pl.Buffered(1)) to save VMEM on v7x.
                pl.BlockSpec((num_convs, 3, Cp, Cp), lambda i: (0, 0, 0, 0)),
                pl.BlockSpec((num_convs, 1, Cp), lambda i: (0, 0, 0)),
                pl.BlockSpec((num_convs, 1, Cp), lambda i: (0, 0, 0)),
            ],
            out_specs=act_spec,
            compiler_params=cparams,
            cost_estimate=cost,
        )(x_nlc, wk, b, a)
    else:
        # Tiled two-pass BatchNorm (train-mode batch statistics): each layer emits
        # conv+PReLU output plus per-tile channel stats; the folded affine is applied
        # at the start of the next layer (or in the finalize kernel for the last one).
        n_real = N if n_pad != N else None
        scale = jnp.ones((1, Cp), jnp.float32)
        shift = jnp.zeros((1, Cp), jnp.float32)
        inv_nl = 1.0 / float(N * L)
        h = x_nlc
        for i in range(num_convs):
            y, s1, s2 = pl.pallas_call(
                functools.partial(_bn_layer_kernel, tile_n=tile_n, n_real=n_real,
                                  mxu_dtype=mxu_dtype),
                out_shape=(jax.ShapeDtypeStruct((n_pad, L, Cp), jnp.float32),
                           jax.ShapeDtypeStruct((num_tiles, 1, Cp), jnp.float32),
                           jax.ShapeDtypeStruct((num_tiles, 1, Cp), jnp.float32)),
                grid=(num_tiles,),
                in_specs=[
                    act_spec, vec_spec, vec_spec,
                    pl.BlockSpec((3, Cp, Cp), lambda i: (0, 0, 0)),
                    vec_spec, vec_spec,
                ],
                out_specs=(act_spec,
                           pl.BlockSpec((1, 1, Cp), lambda i: (i, 0, 0)),
                           pl.BlockSpec((1, 1, Cp), lambda i: (i, 0, 0))),
                compiler_params=cparams,
            )(h, scale, shift, wk[i], b[i], a[i])
            mean = jnp.sum(s1, axis=0) * inv_nl                              # (1, Cp)
            # TODO(synk): one-pass E[y^2]-E[y]^2 in f32; the clamp guards the eps, but a
            #             shifted/Welford accumulation is safer for huge activations.
            var = jnp.maximum(jnp.sum(s2, axis=0) * inv_nl - mean * mean, 0.0)
            scale = g[i][None, :] * jax.lax.rsqrt(var + 1e-5)
            shift = bt[i][None, :] - mean * scale
            h = y
        out_nlc = pl.pallas_call(
            _bn_finalize_kernel,
            out_shape=jax.ShapeDtypeStruct((n_pad, L, Cp), jnp.float32),
            grid=(num_tiles,),
            in_specs=[act_spec, vec_spec, vec_spec, act_spec],
            out_specs=act_spec,
            compiler_params=cparams,
        )(h, scale, shift, x_nlc)

    return jnp.transpose(out_nlc[:N, :, :C], (0, 2, 1))       # back to (N, C, L)


def resunet_conv_ref(x, weights, biases, alphas, gammas, betas, *, batch_norm):
    """Pure-JAX reference matching the PyTorch forward (train-mode BN)."""
    h = x
    for i in range(weights.shape[0]):
        h = jax.lax.conv_general_dilated(
            h, weights[i], window_strides=(1,), padding=[(1, 1)],
            dimension_numbers=('NCH', 'OIH', 'NCH'),
            precision=jax.lax.Precision.HIGHEST)
        h = h + biases[i][None, :, None]
        h = jnp.where(h > 0.0, h, alphas[i] * h)
        if batch_norm:
            mean = jnp.mean(h, axis=(0, 2), keepdims=True)
            var = jnp.mean((h - mean) ** 2, axis=(0, 2), keepdims=True)
            h = (h - mean) * jax.lax.rsqrt(var + 1e-5)
            h = h * gammas[i][None, :, None] + betas[i][None, :, None]
    return h + x


if __name__ == "__main__":
    key = jax.random.PRNGKey(0)
    num_convs = 2
    ok = True
    # second case (N=3) exercises the padded-batch / masked-statistics path
    for (N, C, L) in [(2, 4, 16), (3, 5, 16)]:
        key, kx, kw, kb = jax.random.split(key, 4)
        x = jax.random.normal(kx, (N, C, L), dtype=jnp.float32)

        # PyTorch-like defaults: Conv1d U(+-1/sqrt(C*k)); PReLU alpha=0.25; BN gamma=1, beta=0.
        bound = 1.0 / jnp.sqrt(jnp.float32(C * 3))
        weights = jax.random.uniform(kw, (num_convs, C, C, 3),
                                     minval=-bound, maxval=bound, dtype=jnp.float32)
        biases = jax.random.uniform(kb, (num_convs, C),
                                    minval=-bound, maxval=bound, dtype=jnp.float32)
        alphas = jnp.full((num_convs,), 0.25, dtype=jnp.float32)
        gammas = jnp.ones((num_convs, C), dtype=jnp.float32)
        betas = jnp.zeros((num_convs, C), dtype=jnp.float32)

        for batch_norm in (False, True):
            ref = resunet_conv_ref(x, weights, biases, alphas, gammas, betas,
                                   batch_norm=batch_norm)
            # f32-MXU-input path
            out32 = jax.block_until_ready(
                resunet_conv(x, weights, biases, alphas, gammas, betas,
                             batch_norm=batch_norm, mxu_dtype=jnp.float32))
            ok = ok and bool(jnp.allclose(out32, ref, rtol=5e-2, atol=5e-2))
            # default fast path (bf16 MXU inputs, f32 accumulation)
            out16 = jax.block_until_ready(
                resunet_conv(x, weights, biases, alphas, gammas, betas,
                             batch_norm=batch_norm))
            ok = ok and bool(jnp.allclose(out16, ref, rtol=1e-1, atol=1e-1))

    print("KERNEL_OK" if ok else "MISMATCH")
</pallas_src>

<mosaic_0001>
module attributes {stable_mosaic.version = 11 : i64} {
  func.func @_fused_resunet_kernel(%arg0: i32, %arg1: memref<1x16x128xf32, #tpu.memory_space<vmem>>, %arg2: memref<2x3x128x128xf32, #tpu.memory_space<vmem>>, %arg3: memref<2x1x128xf32, #tpu.memory_space<vmem>>, %arg4: memref<2x1x128xf32, #tpu.memory_space<vmem>>, %arg5: memref<1x16x128xf32, #tpu.memory_space<vmem>>) attributes {dimension_semantics = [#tpu.dimension_semantics<parallel>], iteration_bounds = array<i64: 2>, scalar_prefetch = 0 : i64, scratch_operands = 0 : i64, tpu.core_type = #tpu.core_type<tc>, window_params = [{transform_indices = @transform_0, window_bounds = array<i64: 1, 16, 128>}, {pipeline_mode = #tpu.pipeline_mode<synchronous>, transform_indices = @transform_1, window_bounds = array<i64: 2, 3, 128, 128>}, {pipeline_mode = #tpu.pipeline_mode<synchronous>, transform_indices = @transform_2, window_bounds = array<i64: 2, 1, 128>}, {pipeline_mode = #tpu.pipeline_mode<synchronous>, transform_indices = @transform_3, window_bounds = array<i64: 2, 1, 128>}, {transform_indices = @transform_4, window_bounds = array<i64: 1, 16, 128>}]} {
    %c0 = arith.constant 0 : index
    %c0_0 = arith.constant 0 : index
    %c0_1 = arith.constant 0 : index
    %0 = vector.load %arg1[%c0, %c0_0, %c0_1] : memref<1x16x128xf32, #tpu.memory_space<vmem>>, vector<1x16x128xf32>
    %1 = tpu.iota {dimensions = array<i32: 1>} : vector<1x16x1xi32>
    %c1_i32 = arith.constant 1 : i32
    %2 = vector.broadcast %c1_i32 : i32 to vector<1x16x1xi32>
    %3 = arith.cmpi sge, %1, %2 : vector<1x16x1xi32>
    %c14_i32 = arith.constant 14 : i32
    %4 = vector.broadcast %c14_i32 : i32 to vector<1x16x1xi32>
    %5 = arith.cmpi sle, %1, %4 : vector<1x16x1xi32>
    %c0_2 = arith.constant 0 : index
    %c0_3 = arith.constant 0 : index
    %c0_4 = arith.constant 0 : index
    %c0_5 = arith.constant 0 : index
    %6 = vector.load %arg2[%c0_2, %c0_3, %c0_4, %c0_5] : memref<2x3x128x128xf32, #tpu.memory_space<vmem>>, vector<1x1x128x128xf32>
    %7 = vector.shape_cast %6 : vector<1x1x128x128xf32> to vector<128x128xf32>
    %c0_6 = arith.constant 0 : index
    %c1 = arith.constant 1 : index
    %c0_7 = arith.constant 0 : index
    %c0_8 = arith.constant 0 : index
    %8 = vector.load %arg2[%c0_6, %c1, %c0_7, %c0_8] : memref<2x3x128x128xf32, #tpu.memory_space<vmem>>, vector<1x1x128x128xf32>
    %9 = vector.shape_cast %8 : vector<1x1x128x128xf32> to vector<128x128xf32>
    %c0_9 = arith.constant 0 : index
    %c2 = arith.constant 2 : index
    %c0_10 = arith.constant 0 : index
    %c0_11 = arith.constant 0 : index
    %10 = vector.load %arg2[%c0_9, %c2, %c0_10, %c0_11] : memref<2x3x128x128xf32, #tpu.memory_space<vmem>>, vector<1x1x128x128xf32>
    %11 = vector.shape_cast %10 : vector<1x1x128x128xf32> to vector<128x128xf32>
    %c0_12 = arith.constant 0 : index
    %c0_13 = arith.constant 0 : index
    %c0_14 = arith.constant 0 : index
    %12 = vector.load %arg3[%c0_12, %c0_13, %c0_14] : memref<2x1x128xf32, #tpu.memory_space<vmem>>, vector<1x1x128xf32>
    %13 = vector.shape_cast %12 : vector<1x1x128xf32> to vector<1x128xf32>
    %14 = vector.shape_cast %13 : vector<1x128xf32> to vector<1x1x128xf32>
    %c0_15 = arith.constant 0 : index
    %c0_16 = arith.constant 0 : index
    %c0_17 = arith.constant 0 : index
    %15 = vector.load %arg4[%c0_15, %c0_16, %c0_17] : memref<2x1x128xf32, #tpu.memory_space<vmem>>, vector<1x1x128xf32>
    %16 = vector.shape_cast %15 : vector<1x1x128xf32> to vector<1x128xf32>
    %17 = vector.shape_cast %16 : vector<1x128xf32> to vector<1x1x128xf32>
    %c1_i32_18 = arith.constant 1 : i32
    %18 = tpu.dynamic_rotate %0 by %c1_i32_18 dim 1 : vector<1x16x128xf32>, i32 -> vector<1x16x128xf32>
    %cst = arith.constant 0.000000e+00 : f32
    %19 = vector.shape_cast %3 : vector<1x16x1xi1> to vector<1x16x1xi1>
    %20 = vector.broadcast %19 : vector<1x16x1xi1> to vector<1x16x128xi1>
    %21 = vector.broadcast %cst : f32 to vector<1x16x128xf32>
    %22 = arith.select %20, %18, %21 : vector<1x16x128xi1>, vector<1x16x128xf32>
    %c15_i32 = arith.constant 15 : i32
    %23 = tpu.dynamic_rotate %0 by %c15_i32 dim 1 : vector<1x16x128xf32>, i32 -> vector<1x16x128xf32>
    %cst_19 = arith.constant 0.000000e+00 : f32
    %24 = vector.shape_cast %5 : vector<1x16x1xi1> to vector<1x16x1xi1>
    %25 = vector.broadcast %24 : vector<1x16x1xi1> to vector<1x16x128xi1>
    %26 = vector.broadcast %cst_19 : f32 to vector<1x16x128xf32>
    %27 = arith.select %25, %23, %26 : vector<1x16x128xi1>, vector<1x16x128xf32>
    %28 = vector.shape_cast %22 : vector<1x16x128xf32> to vector<16x128xf32>
    %cst_20 = arith.constant dense<0.000000e+00> : vector<16x128xf32>
    %29 = tpu.matmul %28, %7, %cst_20 {dimension_numbers = #tpu.dot_dimension_numbers<[1], [0], [0], [1], [0, 0, 1, 1], [], []>} : vector<16x128xf32>, vector<128x128xf32>, vector<16x128xf32> -> vector<16x128xf32>
    %30 = vector.shape_cast %0 : vector<1x16x128xf32> to vector<16x128xf32>
    %cst_21 = arith.constant dense<0.000000e+00> : vector<16x128xf32>
    %31 = tpu.matmul %30, %9, %cst_21 {dimension_numbers = #tpu.dot_dimension_numbers<[1], [0], [0], [1], [0, 0, 1, 1], [], []>} : vector<16x128xf32>, vector<128x128xf32>, vector<16x128xf32> -> vector<16x128xf32>
    %32 = arith.addf %29, %31 : vector<16x128xf32>
    %33 = vector.shape_cast %27 : vector<1x16x128xf32> to vector<16x128xf32>
    %cst_22 = arith.constant dense<0.000000e+00> : vector<16x128xf32>
    %34 = tpu.matmul %33, %11, %cst_22 {dimension_numbers = #tpu.dot_dimension_numbers<[1], [0], [0], [1], [0, 0, 1, 1], [], []>} : vector<16x128xf32>, vector<128x128xf32>, vector<16x128xf32> -> vector<16x128xf32>
    %35 = arith.addf %32, %34 : vector<16x128xf32>
    %36 = vector.shape_cast %35 : vector<16x128xf32> to vector<1x16x128xf32>
    %37 = vector.broadcast %14 : vector<1x1x128xf32> to vector<1x16x128xf32>
    %38 = arith.addf %36, %37 : vector<1x16x128xf32>
    %cst_23 = arith.constant 0.000000e+00 : f32
    %39 = vector.broadcast %cst_23 : f32 to vector<1x16x128xf32>
    %40 = arith.cmpf ogt, %38, %39 : vector<1x16x128xf32>
    %41 = vector.broadcast %17 : vector<1x1x128xf32> to vector<1x16x128xf32>
    %42 = arith.mulf %41, %38 : vector<1x16x128xf32>
    %43 = arith.select %40, %38, %42 : vector<1x16x128xi1>, vector<1x16x128xf32>
    %c1_24 = arith.constant 1 : index
    %c0_25 = arith.constant 0 : index
    %c0_26 = arith.constant 0 : index
    %c0_27 = arith.constant 0 : index
    %44 = vector.load %arg2[%c1_24, %c0_25, %c0_26, %c0_27] : memref<2x3x128x128xf32, #tpu.memory_space<vmem>>, vector<1x1x128x128xf32>
    %45 = vector.shape_cast %44 : vector<1x1x128x128xf32> to vector<128x128xf32>
    %c1_28 = arith.constant 1 : index
    %c1_29 = arith.constant 1 : index
    %c0_30 = arith.constant 0 : index
    %c0_31 = arith.constant 0 : index
    %46 = vector.load %arg2[%c1_28, %c1_29, %c0_30, %c0_31] : memref<2x3x128x128xf32, #tpu.memory_space<vmem>>, vector<1x1x128x128xf32>
    %47 = vector.shape_cast %46 : vector<1x1x128x128xf32> to vector<128x128xf32>
    %c1_32 = arith.constant 1 : index
    %c2_33 = arith.constant 2 : index
    %c0_34 = arith.constant 0 : index
    %c0_35 = arith.constant 0 : index
    %48 = vector.load %arg2[%c1_32, %c2_33, %c0_34, %c0_35] : memref<2x3x128x128xf32, #tpu.memory_space<vmem>>, vector<1x1x128x128xf32>
    %49 = vector.shape_cast %48 : vector<1x1x128x128xf32> to vector<128x128xf32>
    %c1_36 = arith.constant 1 : index
    %c0_37 = arith.constant 0 : index
    %c0_38 = arith.constant 0 : index
    %50 = vector.load %arg3[%c1_36, %c0_37, %c0_38] : memref<2x1x128xf32, #tpu.memory_space<vmem>>, vector<1x1x128xf32>
    %51 = vector.shape_cast %50 : vector<1x1x128xf32> to vector<1x128xf32>
    %52 = vector.shape_cast %51 : vector<1x128xf32> to vector<1x1x128xf32>
    %c1_39 = arith.constant 1 : index
    %c0_40 = arith.constant 0 : index
    %c0_41 = arith.constant 0 : index
    %53 = vector.load %arg4[%c1_39, %c0_40, %c0_41] : memref<2x1x128xf32, #tpu.memory_space<vmem>>, vector<1x1x128xf32>
    %54 = vector.shape_cast %53 : vector<1x1x128xf32> to vector<1x128xf32>
    %55 = vector.shape_cast %54 : vector<1x128xf32> to vector<1x1x128xf32>
    %c1_i32_42 = arith.constant 1 : i32
    %56 = tpu.dynamic_rotate %43 by %c1_i32_42 dim 1 : vector<1x16x128xf32>, i32 -> vector<1x16x128xf32>
    %cst_43 = arith.constant 0.000000e+00 : f32
    %57 = vector.shape_cast %3 : vector<1x16x1xi1> to vector<1x16x1xi1>
    %58 = vector.broadcast %57 : vector<1x16x1xi1> to vector<1x16x128xi1>
    %59 = vector.broadcast %cst_43 : f32 to vector<1x16x128xf32>
    %60 = arith.select %58, %56, %59 : vector<1x16x128xi1>, vector<1x16x128xf32>
    %c15_i32_44 = arith.constant 15 : i32
    %61 = tpu.dynamic_rotate %43 by %c15_i32_44 dim 1 : vector<1x16x128xf32>, i32 -> vector<1x16x128xf32>
    %cst_45 = arith.constant 0.000000e+00 : f32
    %62 = vector.shape_cast %5 : vector<1x16x1xi1> to vector<1x16x1xi1>
    %63 = vector.broadcast %62 : vector<1x16x1xi1> to vector<1x16x128xi1>
    %64 = vector.broadcast %cst_45 : f32 to vector<1x16x128xf32>
    %65 = arith.select %63, %61, %64 : vector<1x16x128xi1>, vector<1x16x128xf32>
    %66 = vector.shape_cast %60 : vector<1x16x128xf32> to vector<16x128xf32>
    %cst_46 = arith.constant dense<0.000000e+00> : vector<16x128xf32>
    %67 = tpu.matmul %66, %45, %cst_46 {dimension_numbers = #tpu.dot_dimension_numbers<[1], [0], [0], [1], [0, 0, 1, 1], [], []>} : vector<16x128xf32>, vector<128x128xf32>, vector<16x128xf32> -> vector<16x128xf32>
    %68 = vector.shape_cast %43 : vector<1x16x128xf32> to vector<16x128xf32>
    %cst_47 = arith.constant dense<0.000000e+00> : vector<16x128xf32>
    %69 = tpu.matmul %68, %47, %cst_47 {dimension_numbers = #tpu.dot_dimension_numbers<[1], [0], [0], [1], [0, 0, 1, 1], [], []>} : vector<16x128xf32>, vector<128x128xf32>, vector<16x128xf32> -> vector<16x128xf32>
    %70 = arith.addf %67, %69 : vector<16x128xf32>
    %71 = vector.shape_cast %65 : vector<1x16x128xf32> to vector<16x128xf32>
    %cst_48 = arith.constant dense<0.000000e+00> : vector<16x128xf32>
    %72 = tpu.matmul %71, %49, %cst_48 {dimension_numbers = #tpu.dot_dimension_numbers<[1], [0], [0], [1], [0, 0, 1, 1], [], []>} : vector<16x128xf32>, vector<128x128xf32>, vector<16x128xf32> -> vector<16x128xf32>
    %73 = arith.addf %70, %72 : vector<16x128xf32>
    %74 = vector.shape_cast %73 : vector<16x128xf32> to vector<1x16x128xf32>
    %75 = vector.broadcast %52 : vector<1x1x128xf32> to vector<1x16x128xf32>
    %76 = arith.addf %74, %75 : vector<1x16x128xf32>
    %cst_49 = arith.constant 0.000000e+00 : f32
    %77 = vector.broadcast %cst_49 : f32 to vector<1x16x128xf32>
    %78 = arith.cmpf ogt, %76, %77 : vector<1x16x128xf32>
    %79 = vector.broadcast %55 : vector<1x1x128xf32> to vector<1x16x128xf32>
    %80 = arith.mulf %79, %76 : vector<1x16x128xf32>
    %81 = arith.select %78, %76, %80 : vector<1x16x128xi1>, vector<1x16x128xf32>
    %82 = arith.addf %81, %0 : vector<1x16x128xf32>
    %c0_50 = arith.constant 0 : index
    %c0_51 = arith.constant 0 : index
    %c0_52 = arith.constant 0 : index
    %83 = vector.load %arg5[%c0_50, %c0_51, %c0_52] : memref<1x16x128xf32, #tpu.memory_space<vmem>>, vector<1x16x128xf32>
    tpu.vector_store %arg5[%c0_50, %c0_51, %c0_52], %82 {strides = array<i32>} : memref<1x16x128xf32, #tpu.memory_space<vmem>>, vector<1x16x128xf32>,
    return
  }
  func.func @transform_0(%arg0: i32) -> (i32, i32, i32) {
    %c0_i32 = arith.constant 0 : i32
    %c0_i32_0 = arith.constant 0 : i32
    %c0_i32_1 = arith.constant 0 : i32
    return %arg0, %c0_i32, %c0_i32_0 : i32, i32, i32
  }
  func.func @transform_1(%arg0: i32) -> (i32, i32, i32, i32) {
    %c0_i32 = arith.constant 0 : i32
    %c0_i32_0 = arith.constant 0 : i32
    %c0_i32_1 = arith.constant 0 : i32
    %c0_i32_2 = arith.constant 0 : i32
    %c0_i32_3 = arith.constant 0 : i32
    return %c0_i32, %c0_i32_0, %c0_i32_1, %c0_i32_2 : i32, i32, i32, i32
  }
  func.func @transform_2(%arg0: i32) -> (i32, i32, i32) {
    %c0_i32 = arith.constant 0 : i32
    %c0_i32_0 = arith.constant 0 : i32
    %c0_i32_1 = arith.constant 0 : i32
    %c0_i32_2 = arith.constant 0 : i32
    return %c0_i32, %c0_i32_0, %c0_i32_1 : i32, i32, i32
  }
  func.func @transform_3(%arg0: i32) -> (i32, i32, i32) {
    %c0_i32 = arith.constant 0 : i32
    %c0_i32_0 = arith.constant 0 : i32
    %c0_i32_1 = arith.constant 0 : i32
    %c0_i32_2 = arith.constant 0 : i32
    return %c0_i32, %c0_i32_0, %c0_i32_1 : i32, i32, i32
  }
  func.func @transform_4(%arg0: i32) -> (i32, i32, i32) {
    %c0_i32 = arith.constant 0 : i32
    %c0_i32_0 = arith.constant 0 : i32
    %c0_i32_1 = arith.constant 0 : i32
    return %arg0, %c0_i32, %c0_i32_0 : i32, i32, i32
  }
}

</mosaic_0001>

<bundles_post_ra>
// kernel: tpu_custom_call.1
= control target key start
LH: loop header
LB: loop body
LE: loop exit
PB: predicated region body
PF: predicated region fallthrough
CT: control target
= control target key end

     0   :  { %9 = vsyncpa [#allocation3], 0  ;;  %s1795_s0 = inlined_call_operand.hbm [shape: f32[2,16,128], index: 0, kind: input, shape index: {}]   ;;  %s1796_s1 = inlined_call_operand.hbm [shape: f32[2,3,128,128], index: 1, kind: input, shape index: {}]   ;;  %s1797_s2 = inlined_call_operand.vmem [shape: f32[2,1,128], index: 2, kind: input, shape index: {}]   ;;  %s1798_s3 = inlined_call_operand.vmem [shape: f32[2,1,128], index: 3, kind: input, shape index: {}]   ;;  %s1799_s4 = inlined_call_operand.hbm [shape: f32[2,16,128], index: 4, kind: output, shape index: {}]  }
   0x1   :  { %11 = vsyncpa [#allocation3 + $0x1], 0 }
   0x2   :  { %12 = vsyncpa [#allocation6], 0 }
   0x3   :  { %13 = vsyncpa [#allocation4], 0 }
   0x4   :  { %15 = vsyncpa [#allocation4 + $0x1], 0  ;;  %s1539_s15 = smov 0   ;;  %s1541_s16 = smov 0  }
   0x5   :  { %s1543_s17 = smov 0   ;;  %s1545_s18 = smov 0  }
   0x6 LB: > { %s1560_s19 = sadd.s32 4294967295, %s1505_s18   ;;  %s976_s20 = sadd.s32 4294967294, %s1505_s18   ;;  %s1505_s18 = sphi %s1545_s18, %s1821_s18   ;;  %s1501_s17 = sphi %s1543_s17, %s1820_s17   ;;  %s1497_s16 = sphi %s1541_s16, %s1819_s16   ;;  %s1493_s15 = sphi %s1539_s15, %s1818_s15  }
   0x7   : > { %p41_p0 = scmp.ne.s32.totalorder %s1497_s16, %s1493_s15  ;;  %p1800_p1 = scmp.eq.s32.totalorder %s1560_s19, 0 }
   0x8   : > { %p134_p3 = scmp.eq.s32.totalorder %s976_s20, 1  ;;  %p977_p5 = scmp.ge.s32.totalorder %s1505_s18, 1 }
   0x9   : > { %p1569_p4 = por %p1800_p1, %p41_p0  ;;  %p141_p7 = scmp.lt.s32.totalorder %s1505_s18, 3 }
   0xa   : > { %p1574_p6 = por %p134_p3, %p41_p0  ;;  %s1507_s24 = smov [#allocation5]  }
   0xb   : > { %s1804_s21 = scalar_select %p1569_p4, 1, 0 }
   0xc   : > { %s1805_s22 = scalar_select %p1574_p6, 1, 0 }
   0xd   : > { %p1579_p8 = pnand %p977_p5, %p141_p7  ;;  %s153_s25 = sshll.u32 %s1507_s24, 4  ;;  %s154_s25 = int_to_ptr.vmem [resolvable:$true] %s153_s25 }
   0xe   : > { %s1593_s27 = sadd.s32 1, %s1505_s18   ;;  %s28_s28 = sadd.s32 1, %s1501_s17 }
   0xf   : > { %s1806_s23 = scalar_select %p1579_p8, 1, 0 }
  0x10   : > { %p1330_p9 = pneg %p1579_p8  ;;  %s25_s29 = ssub.s32 %s1505_s18, %s1593_s27 }
  0x11   : > { %s1394_s30 = scalar_lea.vmem %s154_s25, 12288  ;;  %p1402_p5 = scmp.lt.s32.totalorder %s154_s25, %s154_s25 }
  0x12   : > { %p1588_p11 = pnand %p1330_p9, %p1800_p1  ;;  %p1395_p13 = scmp.ne.s32.totalorder %s154_s25, %s1394_s30 }
  0x13   : > { %p1403_p7 = scmp.lt.s32.totalorder %s1394_s30, %s1394_s30 }
  0x14   : > { %p1385_p12 = pneg %p1588_p11 }
  0x15   : > { %p1404_p10 = por %p1403_p7, %p1402_p5 }
  0x16   : > { %p1397_p0 = pnand %p1395_p13, %p1385_p12 }
  0x18   : > { %p1398_p3 = pneg %p1397_p0 }
  0x1a   : > { %p1405_p2 = pnand %p1404_p10, %p1398_p3 }
  0x1c   : > { %1408 = shalt.err (!%p1405_p2)
}
  0x1d   : > { %s1508_s5 = smov 128   ;;  %s1509_s6 = smov 8  }
  0x1e   : > { %1333 = dma.hbm_to_vmem [thread:$0]  (!%p1588_p11), %s1796_s1, 12288, %s154_s25, [#allocation6], %s1508_s5, %s1508_s5, %s1509_s6  }
  0x1f   : > { %p26_p2 = scmp.eq.s32.totalorder %s25_s29, 0  ;;  %p35_p9 = scmp.ne.s32.totalorder %s1501_s17, %s1497_s16 }
  0x20   : > { %p36_p10 = scmp.eq.s32.totalorder %s1505_s18, 0  ;;  %p1343_p12 = scmp.lt.s32.totalorder %s1505_s18, 2 }
  0x21   : > { %s1613_s9 = scalar_select %p26_p2, %s1501_s17, %s28_s28  }
  0x22   : > { %p37_p13 = por %p36_p10, %p35_p9  ;;  %p1808_p0 = scmp.eq.s32.totalorder %s1560_s19, 1 }
  0x23   : > { %s173_s11 = sand.u32 1, %s1501_s17   ;;  %s1002_s12 = sshll.u32 %s1505_s18, 8 }
  0x24   : > { %p1617_p3 = por %p1808_p0, %p35_p9  ;;  %s980_s13 = sshll.u32 %s173_s11, 4 }
  0x25   : > { %s1626_s24 = scalar_lea.hbm %s1795_s0, %s1002_s12  ;;  %s177_s25 = scalar_lea.vmem [#allocation2], %s980_s13 }
  0x26   : > { %s1809_s10 = scalar_select %p1617_p3, 1, 0 }
  0x27   : > { %s184_s26 = sshll.u32 %s177_s25, 4  ;;  %p1628_p11 = pnand %p1343_p12, %p37_p13  ;;  %s1632_s26 = int_to_ptr.vmem [resolvable:$true] %s184_s26 }
  0x28   : > { %s1634_s29 = scalar_lea.sflag [#allocation3], %s173_s11  ;;  %s1409_s30 = scalar_lea.hbm %s1626_s24, 256 }
  0x29   : > { %p1410_p5 = scmp.ne.s32.totalorder %s1626_s24, %s1409_s30  ;;  %p1411_p7 = pneg %p1628_p11 }
  0x2a   : > { %s1414_s12 = scalar_lea.hbm %s1795_s0, 512  ;;  %p1415_p10 = scmp.lt.s32.totalorder %s1626_s24, %s1795_s0 }
  0x2b   : > { %p1412_p2 = pnand %p1411_p7, %p1410_p5  ;;  %p1416_p12 = scmp.lt.s32.totalorder %s1414_s12, %s1409_s30 }
  0x2d   : > { %p1413_p9 = pneg %p1412_p2  ;;  %p1417_p13 = por %p1416_p12, %p1415_p10 }
  0x2f   : > { %p1418_p0 = pnand %p1417_p13, %p1413_p9 }
  0x31   : > { %1421 = shalt.err (!%p1418_p0)
}
  0x32   : > { %s1422_s11 = scalar_lea.vmem %s1632_s26, 256  ;;  %s1510_s20 = smov [#allocation2]  }
  0x33   : > { %p1423_p1 = scmp.ne.s32.totalorder %s1632_s26, %s1422_s11  ;;  %s1427_s25 = sshll.u32 %s1510_s20, 4  ;;  %s1428_s25 = int_to_ptr.vmem [resolvable:$false] %s1427_s25 }
  0x34   : > { %s1429_s7 = scalar_lea.vmem %s1428_s25, 512  ;;  %p1430_p2 = scmp.lt.s32.totalorder %s1632_s26, %s1428_s25 }
  0x35   : > { %p1425_p6 = pnand %p1423_p1, %p1411_p7  ;;  %p1431_p3 = scmp.lt.s32.totalorder %s1429_s7, %s1422_s11 }
  0x37   : > { %p1426_p5 = pneg %p1425_p6  ;;  %p1432_p4 = por %p1431_p3, %p1430_p2 }
  0x39   : > { %p1433_p8 = pnand %p1432_p4, %p1426_p5 }
  0x3b   : > { %1436 = shalt.err (!%p1433_p8)
}
  0x3c   : > { %1337 = dma.hbm_to_vmem [thread:$0]  (!%p1628_p11), %s1626_s24, 256, %s1632_s26, %s1634_s29, %s1508_s5, %s1508_s5, %s1509_s6  }
  0x3d   : > { %p1811_p1 = scmp.ne.s32.totalorder %s1806_s23, 0 }
  0x3e   : > { %s1661_s30 = sand.u32 (!%p1811_p1), 1, %s1497_s16   ;;  %p1812_p4 = scmp.ne.s32.totalorder (!%p1811_p1), %s1804_s21, 0 }
  0x3f   : > { %196 = sbr.rel (%p1811_p1) target bundleno = 592 (0x250), region = 36  ;;  %s984_s8 = sshll.u32 (!%p1811_p1), %s1661_s30, 4 }
  0x40   : > { %s199_s12 = scalar_lea.sflag (!%p1811_p1), [#allocation3], %s1661_s30  ;;  %s1667_s28 = scalar_lea.vmem (!%p1811_p1), [#allocation2], %s984_s8 }
  0x44   : > { %1480 = dma.done.wait (%p1812_p4), %s199_s12, 256  }
  0x45   : > { %1482 = vsyncadd (%p1812_p4), %s199_s12, 4294967040  ;;  %p1813_p6 = scmp.eq.s32.totalorder %s1560_s19, 0 }
  0x47   : > { %1484 = dma.done.wait (%p1813_p6), [#allocation6], 12288   ;;  %p1814_p8 = pmov %p1813_p6 }
  0x48   : > { %v272_v0 = vld [vmem:[#allocation5 + $0xf8] sm:$0xff]  ;;  %v271_v2 = vld [vmem:[#allocation5 + $0xf0] sm:$0xff]  ;;  %v270_v4 = vld [vmem:[#allocation5 + $0xe8] sm:$0xff]  ;;  %v233_v22 = vlaneseq  ;;  %s1003_s14 = sshll.u32 %s1560_s19, 8  ;;  %s230_s11 = scalar_lea.vmem [#allocation7], %s984_s8 }
  0x49   : > { %1486 = vsyncadd (%p1814_p8), [#allocation6], 4294955008  ;;  %v255_v1 = vld [vmem:[#allocation5 + $0x78] sm:$0xff]  ;;  %1112 = vmatprep.subr.mxu0 %v272_v0  ;;  %v254_v3 = vld [vmem:[#allocation5 + $0x70] sm:$0xff]  ;;  %s893_s20 = sshll.u32 %s230_s11, 4  ;;  %s1749_s12 = scalar_lea.hbm %s1799_s4, %s1003_s14  ;;  %s1751_s20 = int_to_ptr.vmem [resolvable:$true] %s893_s20 }
  0x4a   : > { %1147 = vmatprep.subr.mxu1 %v255_v1  ;;  %1113 = vmatpush3.msra.mxu0 %v272_v0  ;;  %v253_v5 = vld [vmem:[#allocation5 + $0x68] sm:$0xff]  ;;  %v269_v6 = vld [vmem:[#allocation5 + $0xe0] sm:$0xff]  ;;  %v268_v8 = vld [vmem:[#allocation5 + $0xd8] sm:$0xff]  ;;  %v1683_v29 = vshrl.u32 %v233_v22, 7  ;;  %s880_s19 = scalar_lea.sflag [#allocation4], %s1661_s30  ;;  %s1437_s8 = scalar_lea.vmem %s1751_s20, 256 }
  0x4b   : > { %1148 = vmatpush3.msra.mxu1 %v255_v1  ;;  %1114 = vmatprep.subr.mxu0 %v271_v2  ;;  %v252_v7 = vld [vmem:[#allocation5 + $0x60] sm:$0xff]  ;;  %v251_v9 = vld [vmem:[#allocation5 + $0x58] sm:$0xff]  ;;  %v267_v10 = vld [vmem:[#allocation5 + $0xd0] sm:$0xff]  ;;  %p1438_p3 = scmp.ne.s32.totalorder %s1751_s20, %s1437_s8  ;;  %p1815_p11 = scmp.ne.s32.totalorder %s1809_s10, 0 }
  0x4c   : > { %1149 = vmatprep.subr.mxu1 %v254_v3  ;;  %1115 = vmatpush3.msra.mxu0 %v271_v2  ;;  %v250_v11 = vld [vmem:[#allocation5 + $0x50] sm:$0xff]  ;;  %v266_v12 = vld [vmem:[#allocation5 + $0xc8] sm:$0xff]  ;;  %v265_v14 = vld [vmem:[#allocation5 + $0xc0] sm:$0xff]  ;;  %vm294_vm0 = vcmp.lt.s32.totalorder %v1683_v29, 1  ;;  %vm305_vm1 = vcmp.lt.s32.totalorder %v1683_v29, 7  ;;  %vm236_vm2 = vcmp.ge.s32.totalorder %v1683_v29, 1 }
  0x4d   : > { %1150 = vmatpush3.msra.mxu1 %v254_v3  ;;  %1116 = vmatprep.subr.mxu0 %v270_v4  ;;  %v249_v13 = vld [vmem:[#allocation5 + $0x48] sm:$0xff]  ;;  %v248_v15 = vld [vmem:[#allocation5 + $0x40] sm:$0xff]  ;;  %v264_v16 = vld [vmem:[#allocation5 + $0xb8] sm:$0xff]  ;;  %v1707_v58 = vadd.s32 8, %v1683_v29  ;;  %p1439_p7 = pnand %p1438_p3, %p1815_p11 }
  0x4e   : > { %1151 = vmatprep.subr.mxu1 %v253_v5  ;;  %1117 = vmatpush3.msra.mxu0 %v270_v4  ;;  %v247_v17 = vld [vmem:[#allocation5 + $0x38] sm:$0xff]  ;;  %v263_v18 = vld [vmem:[#allocation5 + $0xb0] sm:$0xff]  ;;  %v262_v20 = vld [vmem:[#allocation5 + $0xa8] sm:$0xff] }
  0x4f   : > { %1152 = vmatpush3.msra.mxu1 %v253_v5  ;;  %1118 = vmatprep.subr.mxu0 %v269_v6  ;;  %v246_v19 = vld [vmem:[#allocation5 + $0x30] sm:$0xff]  ;;  %v245_v21 = vld [vmem:[#allocation5 + $0x28] sm:$0xff]  ;;  %v261_v23 = vld [vmem:[#allocation5 + $0xa0] sm:$0xff]  ;;  %vm239_vm3 = vcmp.le.s32.totalorder %v1707_v58, 14  ;;  %p1440_p9 = pneg %p1439_p7 }
  0x50   : > { %1153 = vmatprep.subr.mxu1 %v252_v7  ;;  %1119 = vmatpush3.msra.mxu0 %v269_v6  ;;  %v244_v24 = vld [vmem:[#allocation5 + $0x20] sm:$0xff]  ;;  %v260_v25 = vld [vmem:[#allocation5 + $0x98] sm:$0xff]  ;;  %v259_v30 = vld [vmem:[#allocation5 + $0x90] sm:$0xff] }
  0x51   : > { %1154 = vmatpush3.msra.mxu1 %v252_v7  ;;  %1120 = vmatprep.subr.mxu0 %v268_v8  ;;  %v243_v26 = vld [vmem:[#allocation5 + $0x18] sm:$0xff]  ;;  %v1678_v27 = vld [vmem:[%s1667_s28] sm:$0xff]  ;;  %v258_v32 = vld [vmem:[#allocation5 + $0x88] sm:$0xff] }
  0x52   : > { %1155 = vmatprep.subr.mxu1 %v251_v9  ;;  %1121 = vmatpush3.msra.mxu0 %v268_v8  ;;  %v1681_v28 = vld [vmem:[%s1667_s28 + $0x8] sm:$0xff]  ;;  %v242_v31 = vld [vmem:[#allocation5 + $0x10] sm:$0xff]  ;;  %v292_v34 = vrot.slane %v1678_v27, 7  ;;  %v257_v36 = vld [vmem:[#allocation5 + $0x80] sm:$0xff]  ;;  %v303_v38 = vrot.slane %v1678_v27, 1  ;;  %s1511_s28 = smov [#allocation7]  }
  0x53   : > { %1156 = vmatpush3.msra.mxu1 %v251_v9  ;;  %1122 = vmatprep.subr.mxu0 %v267_v10  ;;  %v241_v33 = vld [vmem:[#allocation5 + $0x8] sm:$0xff]  ;;  %v293_v35 = vrot.slane %v1681_v28, 7  ;;  %v240_v37 = vld [vmem:[#allocation5] sm:$0xff]  ;;  %v304_v39 = vrot.slane %v1681_v28, 1  ;;  %v289_v42 = vld [vmem:[#allocation5 + $0x178] sm:$0xff]  ;;  %s1441_s21 = sshll.u32 %s1511_s28, 4  ;;  %s1442_s21 = int_to_ptr.vmem [resolvable:$false] %s1441_s21 }
  0x54   : > { %1157 = vmatprep.subr.mxu1 %v250_v11  ;;  %1123 = vmatpush3.msra.mxu0 %v267_v10  ;;  %v288_v44 = vld [vmem:[#allocation5 + $0x170] sm:$0xff]  ;;  %v287_v45 = vld [vmem:[#allocation5 + $0x168] sm:$0xff]  ;;  %v286_v46 = vld [vmem:[#allocation5 + $0x160] sm:$0xff]  ;;  %s1443_s23 = scalar_lea.vmem %s1442_s21, 512  ;;  %p1444_p10 = scmp.lt.s32.totalorder %s1751_s20, %s1442_s21 }
  0x55   : > { %1158 = vmatpush3.msra.mxu1 %v250_v11  ;;  %1124 = vmatprep.subr.mxu0 %v266_v12  ;;  %v296_v40 = vsel %vm294_vm0, %v293_v35, %v292_v34  ;;  %v295_v41 = vsel %vm294_vm0, %v292_v34, %v293_v35  ;;  %v306_v43 = vsel %vm305_vm1, %v303_v38, %v304_v39  ;;  %v285_v47 = vld [vmem:[#allocation5 + $0x158] sm:$0xff]  ;;  %v284_v48 = vld [vmem:[#allocation5 + $0x150] sm:$0xff]  ;;  %v283_v49 = vld [vmem:[#allocation5 + $0x148] sm:$0xff]  ;;  %p1445_p12 = scmp.lt.s32.totalorder %s1443_s23, %s1437_s8 }
  0x56   : > { %1159 = vmatprep.subr.mxu1 %v249_v13  ;;  %1125 = vmatpush3.msra.mxu0 %v266_v12  ;;  %v282_v50 = vld [vmem:[#allocation5 + $0x140] sm:$0xff]  ;;  %v281_v51 = vld [vmem:[#allocation5 + $0x138] sm:$0xff]  ;;  %v280_v52 = vld [vmem:[#allocation5 + $0x130] sm:$0xff]  ;;  %v307_v60 = vsel %vm305_vm1, %v304_v39, %v303_v38 }
  0x57   : > { %1160 = vmatpush3.msra.mxu1 %v249_v13  ;;  %1126 = vmatprep.subr.mxu0 %v265_v14  ;;  %v279_v53 = vld [vmem:[#allocation5 + $0x128] sm:$0xff]  ;;  %v278_v54 = vld [vmem:[#allocation5 + $0x120] sm:$0xff]  ;;  %v277_v55 = vld [vmem:[#allocation5 + $0x118] sm:$0xff]  ;;  %p1446_p13 = por %p1445_p12, %p1444_p10 }
  0x58   : > { %1161 = vmatprep.subr.mxu1 %v248_v15  ;;  %1127 = vmatpush3.msra.mxu0 %v265_v14  ;;  %v276_v56 = vld [vmem:[#allocation5 + $0x110] sm:$0xff]  ;;  %v275_v57 = vld [vmem:[#allocation5 + $0x108] sm:$0xff]  ;;  %v274_v59 = vld [vmem:[#allocation5 + $0x100] sm:$0xff] }
  0x59   : > { %1162 = vmatpush3.msra.mxu1 %v248_v15  ;;  %1128 = vmatprep.subr.mxu0 %v264_v16  ;;  %v594_v61 = vld [vmem:[#allocation5 + $0x278] sm:$0xff]  ;;  %v593_v62 = vld [vmem:[#allocation5 + $0x270] sm:$0xff]  ;;  %v592_v1 = vld [vmem:[#allocation5 + $0x268] sm:$0xff]  ;;  %p1447_p0 = pnand %p1446_p13, %p1440_p9 }
  0x5a   : > { %1163 = vmatprep.subr.mxu1 %v247_v17  ;;  %1129 = vmatpush3.msra.mxu0 %v264_v16  ;;  %v577_v63 = vld [vmem:[#allocation5 + $0x1f8] sm:$0xff]  ;;  %v576_v0 = vld [vmem:[#allocation5 + $0x1f0] sm:$0xff]  ;;  %v575_v2 = vld [vmem:[#allocation5 + $0x1e8] sm:$0xff] }
  0x5b   : > { %1164 = vmatpush3.msra.mxu1 %v247_v17  ;;  %1130 = vmatprep.subr.mxu0 %v263_v18  ;;  %v591_v3 = vld [vmem:[#allocation5 + $0x260] sm:$0xff]  ;;  %v590_v5 = vld [vmem:[#allocation5 + $0x258] sm:$0xff]  ;;  %v589_v7 = vld [vmem:[#allocation5 + $0x250] sm:$0xff] }
  0x5c   : > { %1165 = vmatprep.subr.mxu1 %v246_v19  ;;  %1131 = vmatpush3.msra.mxu0 %v263_v18  ;;  %v574_v4 = vld [vmem:[#allocation5 + $0x1e0] sm:$0xff]  ;;  %v573_v6 = vld [vmem:[#allocation5 + $0x1d8] sm:$0xff]  ;;  %v572_v8 = vld [vmem:[#allocation5 + $0x1d0] sm:$0xff] }
  0x5d   : > { %1166 = vmatpush3.msra.mxu1 %v246_v19  ;;  %1132 = vmatprep.subr.mxu0 %v262_v20  ;;  %v588_v9 = vld [vmem:[#allocation5 + $0x248] sm:$0xff]  ;;  %v587_v11 = vld [vmem:[#allocation5 + $0x240] sm:$0xff]  ;;  %v586_v13 = vld [vmem:[#allocation5 + $0x238] sm:$0xff] }
  0x5e   : > { %1167 = vmatprep.subr.mxu1 %v245_v21  ;;  %1133 = vmatpush3.msra.mxu0 %v262_v20  ;;  %v571_v10 = vld [vmem:[#allocation5 + $0x1c8] sm:$0xff]  ;;  %v570_v12 = vld [vmem:[#allocation5 + $0x1c0] sm:$0xff]  ;;  %v569_v14 = vld [vmem:[#allocation5 + $0x1b8] sm:$0xff] }
  0x5f   : > { %1168 = vmatpush3.msra.mxu1 %v245_v21  ;;  %1134 = vmatprep.subr.mxu0 %v261_v23  ;;  %v585_v15 = vld [vmem:[#allocation5 + $0x230] sm:$0xff]  ;;  %v584_v16 = vld [vmem:[#allocation5 + $0x228] sm:$0xff]  ;;  %v583_v17 = vld [vmem:[#allocation5 + $0x220] sm:$0xff] }
  0x60   : > { %1169 = vmatprep.subr.mxu1 %v244_v24  ;;  %1135 = vmatpush3.msra.mxu0 %v261_v23  ;;  %v568_v18 = vld [vmem:[#allocation5 + $0x1b0] sm:$0xff]  ;;  %v582_v19 = vld [vmem:[#allocation5 + $0x218] sm:$0xff]  ;;  %v567_v20 = vld [vmem:[#allocation5 + $0x1a8] sm:$0xff] }
  0x61   : > { %1170 = vmatpush3.msra.mxu1 %v244_v24  ;;  %1136 = vmatprep.subr.mxu0 %v260_v25  ;;  %v581_v21 = vld [vmem:[#allocation5 + $0x210] sm:$0xff]  ;;  %v566_v22 = vld [vmem:[#allocation5 + $0x1a0] sm:$0xff]  ;;  %v580_v23 = vld [vmem:[#allocation5 + $0x208] sm:$0xff] }
  0x62   : > { %1171 = vmatprep.subr.mxu1 %v243_v26  ;;  %1137 = vmatpush3.msra.mxu0 %v260_v25  ;;  %v565_v24 = vld [vmem:[#allocation5 + $0x198] sm:$0xff]  ;;  %v579_v25 = vld [vmem:[#allocation5 + $0x200] sm:$0xff] }
  0x63   : > { %1172 = vmatpush3.msra.mxu1 %v243_v26  ;;  %1138 = vmatprep.subr.mxu0 %v259_v30  ;;  %v564_v26 = vld [vmem:[#allocation5 + $0x190] sm:$0xff]  ;;  %v989_v38 = vld [vmem:[%s1797_s2] ss:$0 sm:$0xff]  ;;  %v996_v29 = vld [vmem:[%s1798_s3 + $0x1] ss:$0 sm:$0xff] }
  0x64   : > { %1173 = vmatprep.subr.mxu1 %v242_v31  ;;  %1139 = vmatpush3.msra.mxu0 %v259_v30  ;;  %v563_v30 = vld [vmem:[#allocation5 + $0x188] sm:$0xff] }
  0x65   : > { %1174 = vmatpush3.msra.mxu1 %v242_v31  ;;  %1140 = vmatprep.subr.mxu0 %v258_v32  ;;  %v611_v31 = vld [vmem:[#allocation5 + $0x2f8] sm:$0xff] }
  0x66   : > { %1175 = vmatprep.subr.mxu1 %v241_v33  ;;  %1141 = vmatpush3.msra.mxu0 %v258_v32  ;;  %v562_v32 = vld [vmem:[#allocation5 + $0x180] sm:$0xff] }
  0x67   : > { %1176 = vmatpush3.msra.mxu1 %v241_v33  ;;  %1142 = vmatprep.subr.mxu0 %v257_v36 }
  0x68   : > { %1177 = vmatprep.subr.mxu1 %v240_v37  ;;  %1143 = vmatpush3.msra.mxu0 %v257_v36 }
  0x69   : > { %1144 = vmatprep.mubr.f32.mxu0 %v1678_v27  ;;  %1178 = vmatpush3.msra.mxu1 %v240_v37 }
  0x6a   : > { %1179 = vmatprep.mubr.msk.f32.mxu1 %vm236_vm2, %v296_v40  ;;  %1145 = vmatmul.mubr.f32.vlgmr.msra.gmra.mxu0 %v1681_v28 }
  0x6b   : > { %1180 = vmatmul.mubr.f32.vlgmr.msra.gmra.mxu1 %v295_v41  ;;  %1182 = vmatprep.subr.mxu0 %v289_v42 }
  0x6c   : > { %1214 = vmatprep.mubr.f32.mxu0 %v306_v43  ;;  %1183 = vmatpush3.msra.mxu0 %v289_v42  ;;  %v990_v42 = vld [vmem:[%s1798_s3] ss:$0 sm:$0xff] }
  0x6d   : > { %1184 = vmatprep.subr.mxu0 %v288_v44  ;;  %1217 = vmatprep.subr.mxu1 %v594_v61 }
  0x6e   : > { %1185 = vmatpush3.msra.mxu0 %v288_v44  ;;  %1218 = vmatpush3.msra.mxu1 %v594_v61  ;;  %v608_v61 = vld [vmem:[#allocation5 + $0x2e0] sm:$0xff] }
  0x6f   : > { %1186 = vmatprep.subr.mxu0 %v287_v45  ;;  %1219 = vmatprep.subr.mxu1 %v593_v62 }
  0x70   : > { %1187 = vmatpush3.msra.mxu0 %v287_v45  ;;  %1220 = vmatpush3.msra.mxu1 %v593_v62  ;;  %v607_v62 = vld [vmem:[#allocation5 + $0x2d8] sm:$0xff] }
  0x71   : > { %1188 = vmatprep.subr.mxu0 %v286_v46  ;;  %1221 = vmatprep.subr.mxu1 %v592_v1 }
  0x72   : > { %1189 = vmatpush3.msra.mxu0 %v286_v46  ;;  %1222 = vmatpush3.msra.mxu1 %v592_v1  ;;  %v604_v1 = vld [vmem:[#allocation5 + $0x2c0] sm:$0xff] }
  0x73   : > { %1190 = vmatprep.subr.mxu0 %v285_v47  ;;  %1223 = vmatprep.subr.mxu1 %v591_v3 }
  0x74   : > { %1191 = vmatpush3.msra.mxu0 %v285_v47  ;;  %1224 = vmatpush3.msra.mxu1 %v591_v3  ;;  %v602_v3 = vld [vmem:[#allocation5 + $0x2b0] sm:$0xff] }
  0x75   : > { %1192 = vmatprep.subr.mxu0 %v284_v48  ;;  %1225 = vmatprep.subr.mxu1 %v590_v5 }
  0x76   : > { %1193 = vmatpush3.msra.mxu0 %v284_v48  ;;  %1226 = vmatpush3.msra.mxu1 %v590_v5  ;;  %v600_v5 = vld [vmem:[#allocation5 + $0x2a0] sm:$0xff] }
  0x77   : > { %1194 = vmatprep.subr.mxu0 %v283_v49  ;;  %1227 = vmatprep.subr.mxu1 %v589_v7 }
  0x78   : > { %1195 = vmatpush3.msra.mxu0 %v283_v49  ;;  %1228 = vmatpush3.msra.mxu1 %v589_v7  ;;  %v598_v7 = vld [vmem:[#allocation5 + $0x290] sm:$0xff] }
  0x79   : > { %1196 = vmatprep.subr.mxu0 %v282_v50  ;;  %1229 = vmatprep.subr.mxu1 %v588_v9 }
  0x7a   : > { %1197 = vmatpush3.msra.mxu0 %v282_v50  ;;  %1230 = vmatpush3.msra.mxu1 %v588_v9  ;;  %v596_v9 = vld [vmem:[#allocation5 + $0x280] sm:$0xff] }
  0x7b   : > { %1198 = vmatprep.subr.mxu0 %v281_v51  ;;  %1231 = vmatprep.subr.mxu1 %v587_v11 }
  0x7c   : > { %1199 = vmatpush3.msra.mxu0 %v281_v51  ;;  %1232 = vmatpush3.msra.mxu1 %v587_v11 }
  0x7d   : > { %1200 = vmatprep.subr.mxu0 %v280_v52  ;;  %1233 = vmatprep.subr.mxu1 %v586_v13 }
  0x7e   : > { %1201 = vmatpush3.msra.mxu0 %v280_v52  ;;  %1234 = vmatpush3.msra.mxu1 %v586_v13 }
  0x7f   : > { %1202 = vmatprep.subr.mxu0 %v279_v53  ;;  %1235 = vmatprep.subr.mxu1 %v585_v15 }
  0x80   : > { %1203 = vmatpush3.msra.mxu0 %v279_v53  ;;  %1236 = vmatpush3.msra.mxu1 %v585_v15 }
  0x81   : > { %1204 = vmatprep.subr.mxu0 %v278_v54  ;;  %1237 = vmatprep.subr.mxu1 %v584_v16 }
  0x82   : > { %1205 = vmatpush3.msra.mxu0 %v278_v54  ;;  %1238 = vmatpush3.msra.mxu1 %v584_v16  ;;  %v995_v16 = vld [vmem:[%s1797_s2 + $0x1] ss:$0 sm:$0xff] }
  0x83   : > { %1206 = vmatprep.subr.mxu0 %v277_v55  ;;  %1239 = vmatprep.subr.mxu1 %v583_v17 }
  0x84   : > { %1207 = vmatpush3.msra.mxu0 %v277_v55  ;;  %1240 = vmatpush3.msra.mxu1 %v583_v17  ;;  %v610_v55 = vld [vmem:[#allocation5 + $0x2f0] sm:$0xff] }
  0x85   : > { %1208 = vmatprep.subr.mxu0 %v276_v56  ;;  %1241 = vmatprep.subr.mxu1 %v582_v19 }
  0x86   : > { %1209 = vmatpush3.msra.mxu0 %v276_v56  ;;  %1242 = vmatpush3.msra.mxu1 %v582_v19 }
  0x87   : > { %1210 = vmatprep.subr.mxu0 %v275_v57  ;;  %1243 = vmatprep.subr.mxu1 %v581_v21 }
  0x88   : > { %1211 = vmatpush3.msra.mxu0 %v275_v57  ;;  %1244 = vmatpush3.msra.mxu1 %v581_v21 }
  0x89   : > { %1212 = vmatprep.subr.mxu0 %v274_v59  ;;  %1245 = vmatprep.subr.mxu1 %v580_v23 }
  0x8a   : > { %1213 = vmatpush3.msra.mxu0 %v274_v59  ;;  %1246 = vmatpush3.msra.mxu1 %v580_v23 }
  0x8b   : > { %1215 = vmatmul.mubr.msk.f32.vlgmr.msra.gmra.mxu0 %vm239_vm3, %v307_v60  ;;  %1252 = vmatprep.subr.mxu0 %v577_v63  ;;  %v609_v60 = vld [vmem:[#allocation5 + $0x2e8] sm:$0xff] }
  0x8c   : > { %1253 = vmatpush3.msra.mxu0 %v577_v63  ;;  %1247 = vmatprep.subr.mxu1 %v579_v25  ;;  %v606_v63 = vld [vmem:[#allocation5 + $0x2d0] sm:$0xff] }
  0x8d   : > { %1254 = vmatprep.subr.mxu0 %v576_v0  ;;  %1248 = vmatpush3.msra.mxu1 %v579_v25 }
  0x8e   : > { %1255 = vmatpush3.msra.mxu0 %v576_v0  ;;  %1287 = vmatprep.subr.mxu1 %v611_v31  ;;  %v605_v0 = vld [vmem:[#allocation5 + $0x2c8] sm:$0xff] }
  0x8f   : > { %1256 = vmatprep.subr.mxu0 %v575_v2 }
  0x90   : > { %1257 = vmatpush3.msra.mxu0 %v575_v2  ;;  %v603_v2 = vld [vmem:[#allocation5 + $0x2b8] sm:$0xff] }
  0x91   : > { %1258 = vmatprep.subr.mxu0 %v574_v4 }
  0x92   : > { %1259 = vmatpush3.msra.mxu0 %v574_v4  ;;  %v601_v4 = vld [vmem:[#allocation5 + $0x2a8] sm:$0xff] }
  0x93   : > { %1260 = vmatprep.subr.mxu0 %v573_v6 }
  0x94   : > { %1261 = vmatpush3.msra.mxu0 %v573_v6  ;;  %v599_v6 = vld [vmem:[#allocation5 + $0x298] sm:$0xff] }
  0x95   : > { %1262 = vmatprep.subr.mxu0 %v572_v8 }
  0x96   : > { %1263 = vmatpush3.msra.mxu0 %v572_v8  ;;  %v597_v8 = vld [vmem:[#allocation5 + $0x288] sm:$0xff] }
  0x97   : > { %1264 = vmatprep.subr.mxu0 %v571_v10 }
  0x98   : > { %1265 = vmatpush3.msra.mxu0 %v571_v10 }
  0x99   : > { %1266 = vmatprep.subr.mxu0 %v570_v12 }
  0x9a   : > { %1267 = vmatpush3.msra.mxu0 %v570_v12 }
  0x9b   : > { %1268 = vmatprep.subr.mxu0 %v569_v14 }
  0x9c   : > { %1269 = vmatpush3.msra.mxu0 %v569_v14 }
  0x9d   : > { %1270 = vmatprep.subr.mxu0 %v568_v18 }
  0x9e   : > { %1271 = vmatpush3.msra.mxu0 %v568_v18 }
  0x9f   : > { %1272 = vmatprep.subr.mxu0 %v567_v20 }
  0xa0   : > { %1273 = vmatpush3.msra.mxu0 %v567_v20 }
  0xa1   : > { %1274 = vmatprep.subr.mxu0 %v566_v22 }
  0xa2   : > { %1275 = vmatpush3.msra.mxu0 %v566_v22 }
  0xa3   : > { %1276 = vmatprep.subr.mxu0 %v565_v24 }
  0xa4   : > { %1277 = vmatpush3.msra.mxu0 %v565_v24 }
  0xa5   : > { %1278 = vmatprep.subr.mxu0 %v564_v26 }
  0xa6   : > { %1279 = vmatpush3.msra.mxu0 %v564_v26 }
  0xa7   : > { %1280 = vmatprep.subr.mxu0 %v563_v30 }
  0xa8   : > { %1281 = vmatpush3.msra.mxu0 %v563_v30 }
  0xa9   : > { %1282 = vmatprep.subr.mxu0 %v562_v32 }
  0xaa   : > { %1283 = vmatpush3.msra.mxu0 %v562_v32 }
 0x12a   : > { %v1146_v33 = vpop.f32.mrf.mxu0 }
 0x12b   : > { %v1181_v34 = vpop.f32.mrf.mxu1 }
 0x12c   : > { %v380_v35 = vpop.f32.mrf.mxu0  ;;  %v461_v37 = vadd.f32 %v1181_v34, %v1146_v33 }
 0x12d   : > { %v455_v36 = vpop.f32.mrf.mxu1 }
 0x12e   : > { %v456_v40 = vadd.f32 %v455_v36, %v380_v35 }
 0x14b   : > { %v1216_v39 = vpop.f32.mrf.mxu0 }
 0x14c   : > { %v540_v41 = vadd.f32 %v1216_v39, %v461_v37 }
 0x14d   : > { %v530_v43 = vpop.f32.mrf.mxu0 }
 0x14e   : > { %v548_v44 = vadd.f32 %v989_v38, %v540_v41  ;;  %v539_v45 = vadd.f32 %v530_v43, %v456_v40 }
 0x150   : > { %v558_v46 = vmul.f32 %v990_v42, %v548_v44  ;;  %v547_v47 = vadd.f32 %v989_v38, %v539_v45  ;;  %vm550_vm4 = vcmp.gt.f32.partialorder %v548_v44, 0.0 }
 0x152   : > { %vm549_vm5 = vcmp.gt.f32.partialorder %v547_v47, 0.0  ;;  %v557_v48 = vmul.f32 %v990_v42, %v547_v47  ;;  %v560_v49 = vsel %vm550_vm4, %v548_v44, %v558_v46 }
 0x153   : > { %v617_v53 = vrot.slane %v560_v49, 7  ;;  %v623_v54 = vrot.slane %v560_v49, 1 }
 0x154   : > { %v559_v50 = vsel %vm549_vm5, %v547_v47, %v557_v48 }
 0x155   : > { %v616_v51 = vrot.slane %v559_v50, 7  ;;  %v622_v52 = vrot.slane %v559_v50, 1  ;;  %1249 = vmatprep.mubr.f32.mxu1 %v559_v50 }
 0x156   : > { %1250 = vmatmul.mubr.f32.vlgmr.msra.gmra.mxu1 %v560_v49 }
 0x157   : > { %1288 = vmatpush3.msra.mxu1 %v611_v31  ;;  %v619_v56 = vsel %vm294_vm0, %v617_v53, %v616_v51  ;;  %v624_v57 = vsel %vm305_vm1, %v622_v52, %v623_v54  ;;  %v618_v59 = vsel %vm294_vm0, %v616_v51, %v617_v53  ;;  %v625_v10 = vsel %vm305_vm1, %v623_v54, %v622_v52 }
 0x158   : > { %1289 = vmatprep.subr.mxu1 %v610_v55  ;;  %1284 = vmatprep.mubr.msk.f32.mxu0 %vm236_vm2, %v619_v56 }
 0x159   : > { %1290 = vmatpush3.msra.mxu1 %v610_v55  ;;  %1319 = vmatprep.mubr.f32.mxu1 %v624_v57 }
 0x15a   : > { %1285 = vmatmul.mubr.f32.vlgmr.msra.gmra.mxu0 %v618_v59  ;;  %1291 = vmatprep.subr.mxu1 %v609_v60 }
 0x15b   : > { %1292 = vmatpush3.msra.mxu1 %v609_v60 }
 0x15c   : > { %1293 = vmatprep.subr.mxu1 %v608_v61 }
 0x15d   : > { %1294 = vmatpush3.msra.mxu1 %v608_v61 }
 0x15e   : > { %1295 = vmatprep.subr.mxu1 %v607_v62 }
 0x15f   : > { %1296 = vmatpush3.msra.mxu1 %v607_v62 }
 0x160   : > { %1297 = vmatprep.subr.mxu1 %v606_v63 }
 0x161   : > { %1298 = vmatpush3.msra.mxu1 %v606_v63 }
 0x162   : > { %1299 = vmatprep.subr.mxu1 %v605_v0 }
 0x163   : > { %1300 = vmatpush3.msra.mxu1 %v605_v0 }
 0x164   : > { %1301 = vmatprep.subr.mxu1 %v604_v1 }
 0x165   : > { %1302 = vmatpush3.msra.mxu1 %v604_v1 }
 0x166   : > { %1303 = vmatprep.subr.mxu1 %v603_v2 }
 0x167   : > { %1304 = vmatpush3.msra.mxu1 %v603_v2 }
 0x168   : > { %1305 = vmatprep.subr.mxu1 %v602_v3 }
 0x169   : > { %1306 = vmatpush3.msra.mxu1 %v602_v3 }
 0x16a   : > { %1307 = vmatprep.subr.mxu1 %v601_v4 }
 0x16b   : > { %1308 = vmatpush3.msra.mxu1 %v601_v4 }
 0x16c   : > { %1309 = vmatprep.subr.mxu1 %v600_v5 }
 0x16d   : > { %1310 = vmatpush3.msra.mxu1 %v600_v5 }
 0x16e   : > { %1311 = vmatprep.subr.mxu1 %v599_v6 }
 0x16f   : > { %1312 = vmatpush3.msra.mxu1 %v599_v6 }
 0x170   : > { %1313 = vmatprep.subr.mxu1 %v598_v7 }
 0x171   : > { %1314 = vmatpush3.msra.mxu1 %v598_v7 }
 0x172   : > { %1315 = vmatprep.subr.mxu1 %v597_v8 }
 0x173   : > { %1316 = vmatpush3.msra.mxu1 %v597_v8 }
 0x174   : > { %1317 = vmatprep.subr.mxu1 %v596_v9 }
 0x175   : > { %1318 = vmatpush3.msra.mxu1 %v596_v9 }
 0x176   : > { %1320 = vmatmul.mubr.msk.f32.vlgmr.msra.gmra.mxu1 %vm239_vm3, %v625_v10 }
 0x216   : > { %v1251_v11 = vpop.f32.mrf.mxu1 }
 0x218   : > { %v694_v13 = vpop.f32.mrf.mxu1 }
 0x21a   : > { %v1286_v12 = vpop.f32.mrf.mxu0 }
 0x21b   : > { %v775_v15 = vadd.f32 %v1286_v12, %v1251_v11 }
 0x21c   : > { %v769_v14 = vpop.f32.mrf.mxu0 }
 0x21d   : > { %v770_v18 = vadd.f32 %v769_v14, %v694_v13 }
 0x236   : > { %v1321_v17 = vpop.f32.mrf.mxu1 }
 0x237   : > { %v854_v19 = vadd.f32 %v1321_v17, %v775_v15 }
 0x238   : > { %v844_v58 = vpop.f32.mrf.mxu1 }
 0x239   : > { %v862_v20 = vadd.f32 %v995_v16, %v854_v19  ;;  %v853_v21 = vadd.f32 %v844_v58, %v770_v18 }
 0x23b   : > { %vm864_vm6 = vcmp.gt.f32.partialorder %v862_v20, 0.0  ;;  %v872_v22 = vmul.f32 %v996_v29, %v862_v20  ;;  %v861_v23 = vadd.f32 %v995_v16, %v853_v21 }
 0x23d   : > { %v874_v24 = vsel %vm864_vm6, %v862_v20, %v872_v22  ;;  %vm863_vm7 = vcmp.gt.f32.partialorder %v861_v23, 0.0  ;;  %v871_v25 = vmul.f32 %v996_v29, %v861_v23 }
 0x23e   : > { %v876_v26 = vadd.f32 %v874_v24, %v1681_v28 }
 0x23f   : > { %v873_v30 = vsel %vm863_vm7, %v861_v23, %v871_v25 }
 0x240   : > { %878 = vst [vmem:[%s230_s11 + $0x8] sm:$0xff] %v876_v26  ;;  %v875_v31 = vadd.f32 %v873_v30, %v1678_v27 }
 0x242   : > { %877 = vst [vmem:[%s230_s11] sm:$0xff] %v875_v31 }
 0x243   : > { %1450 = shalt.err (!%p1447_p0)
}
 0x244   : > { %s1451_s5 = scalar_lea.hbm %s1749_s12, 256  ;;  %s1455_s26 = scalar_lea.hbm %s1799_s4, 512 }
 0x245   : > { %p1452_p5 = scmp.ne.s32.totalorder %s1749_s12, %s1451_s5  ;;  %p1456_p4 = scmp.lt.s32.totalorder %s1749_s12, %s1799_s4 }
 0x246   : > { %p1457_p6 = scmp.lt.s32.totalorder %s1455_s26, %s1451_s5 }
 0x247   : > { %p1453_p2 = pnand %p1452_p5, %p1815_p11 }
 0x248   : > { %p1458_p8 = por %p1457_p6, %p1456_p4 }
 0x249   : > { %p1454_p1 = pneg %p1453_p2 }
 0x24b   : > { %p1459_p3 = pnand %p1458_p8, %p1454_p1 }
 0x24d   : > { %1462 = shalt.err (!%p1459_p3)
}
 0x24e   : > { %s1512_s14 = smov 128   ;;  %s1513_s11 = smov 8  }
 0x24f   : > { %1328 = dma.vmem_to_hbm [thread:$0]  (%p1815_p11), %s1751_s20, 256, %s1749_s12, %s880_s19, %s1512_s14, %s1512_s14, %s1513_s11  }
 0x250 PF: > { %s908_s25 = sand.u32 1, %s1493_s15   ;;  %p1816_p7 = scmp.ne.s32.totalorder %s1805_s22, 0 }
 0x251   : > { %p1817_p9 = scmp.ge.s32.totalorder %s1505_s18, 2  ;;  %s909_s7 = scalar_lea.sflag [#allocation4], %s908_s25 }
 0x253   : > { %p1339_p10 = pnand %p1817_p9, %p1816_p7 }
 0x255   : > { %p1340_p12 = pneg %p1339_p10 }
 0x257   : > { %1488 = dma.done.wait (%p1340_p12), %s909_s7, 256  }
 0x258   : > { %1490 = vsyncadd (%p1340_p12), %s909_s7, 4294967040  ;;  %p18_p13 = scmp.ge.s32.totalorder %s1593_s27, 4   ;;  %s1818_s15 = smov %s1497_s16 }
 0x259   : > { %s1819_s16 = smov %s1501_s17  ;;  %s1820_s17 = smov %s1613_s9 }
 0x25a   : > { %s1821_s18 = smov %s1593_s27  ;;  %20 = sbr.rel (!%p18_p13) target bundleno = 6 (0x6), region = 92 }
 0x25f   :  { %914 = vsyncpa [#allocation3], 1 }
 0x260   :  { %916 = vsyncpa [#allocation3 + $0x1], 1 }
 0x261   :  { %917 = vsyncpa [#allocation6], 1 }
 0x262   :  { %918 = vsyncpa [#allocation4], 1 }
 0x263   :  { %920 = vsyncpa [#allocation4 + $0x1], 1 }

</bundles_post_ra>
